<compile_context>
chip_gen: v7x
topology: tpu7x:2x2x1
jax: 0.10.0
libtpu: 0.0.40
codegen_flags: <defaults>
</compile_context>

<pallas_src>
import jax
import jax.numpy as jnp
from jax.experimental import pallas as pl
from jax.experimental.pallas import tpu as pltpu


def _make_kernel(maxpos: int, nbin: int):
    def kernel(idx_row_ref, idx_col_ref, chain_ref, thi_ref, tlo_ref, out_ref):
        # idx_row_ref: (1, 1, L)   int32 — residue index along the j (column/lane) axis
        # idx_col_ref: (1, TI, 1)  int32 — residue index for this i (row/sublane) tile
        # chain_ref:   (1, TI, L)  int32 — same_chain mask (0/1) for this tile
        # thi_ref:     (KPAD, d)   bf16  — hi half of the pre-projected tables
        # tlo_ref:     (KPAD, d)   bf16  — lo half (T_hi + T_lo == f32 table)
        #   rows [0..nbin]        = emb_weight @ W1.T
        #   rows [nbin+1,nbin+2]  = emb_chain_weight @ W2.T
        # out_ref:     (1, TI, L, d)
        _, ti, ell, d_model = out_ref.shape
        kpad = thi_ref.shape[0]

        idx_j = idx_row_ref[0]                 # (1, L)
        idx_i = idx_col_ref[0]                 # (TI, 1)
        sc = chain_ref[0]                      # (TI, L), values in {0, 1}

        seqsep = idx_j - idx_i + maxpos        # (TI, L) = idx[j] - idx[i] + maxpos
        seqsep = jnp.clip(seqsep, 0, nbin - 1)
        seqsep = jnp.where(sc > 0, seqsep, nbin)   # inter-chain bin when same_chain==0

        # Two-hot selection matrix: column `seqsep` picks the residue-offset embedding,
        # column `nbin+1+sc` picks the chain embedding; the matmul sums both rows of the
        # pre-projected table == project(cat(emb(seqsep), emb_chain(sc))).
        col = jax.lax.broadcasted_iota(jnp.int32, (ti, ell, kpad), 2)
        hot = (col == seqsep[:, :, None]) | (col == sc[:, :, None] + (nbin + 1))
        two_hot = hot.astype(jnp.bfloat16).reshape(ti * ell, kpad)   # exact 0/1 in bf16

        # Two bf16 MXU passes with f32 accumulation reproduce the f32 table lookup:
        #   two_hot @ (T_hi + T_lo) == two_hot @ T  (up to ~2^-16 relative split error).
        y = jnp.dot(two_hot, thi_ref[...], preferred_element_type=jnp.float32)
        y = y + jnp.dot(two_hot, tlo_ref[...], preferred_element_type=jnp.float32)
        out_ref[0] = y.reshape(ti, ell, d_model).astype(out_ref.dtype)

    return kernel


def _choose_row_tile(L: int, d_model: int, budget_bytes: int = 12 << 20) -> int:
    """Largest row tile TI (multiple of 8 dividing L, or L itself) whose double-buffered,
    lane-padded VMEM footprint stays under `budget_bytes` (safe under the 32MiB scoped
    VMEM limit on v5e/v6e/v7x)."""
    out_lanes = -(-d_model // 128) * 128
    in_lanes = -(-L // 128) * 128

    def block_bytes(ti):
        # output block (f32, double-buffered) + same_chain block (i32, double-buffered)
        return ti * L * out_lanes * 4 * 2 + ti * in_lanes * 4 * 2

    cands = sorted({ti for ti in range(8, L + 1, 8) if L % ti == 0} | {L})
    best = cands[0]
    for ti in cands:
        if block_bytes(ti) <= budget_bytes:
            best = ti
    return best


def positional_encoding_2d_forward(idx, same_chain, emb_w, emb_chain_w, proj_w,
                                   minpos=-31, maxpos=31):
    """idx: (B, L) int; same_chain: (B, L, L) in {0,1};
    emb_w: (nbin+1, d_model); emb_chain_w: (2, d_model);
    proj_w: (d_model, 2*d_model) (PyTorch Linear layout, bias-free).
    Returns (B, L, L, d_model) float32."""
    nbin = abs(minpos) + maxpos + 1
    B, L = idx.shape
    d_model = proj_w.shape[0]

    idx = idx.astype(jnp.int32)
    same_chain = same_chain.astype(jnp.int32)

    # Fold the bias-free projection into the two tiny embedding tables (glue matmuls):
    #   project(cat(emb[s], emb_chain[c])) == (emb @ W1.T)[s] + (emb_chain @ W2.T)[c]
    w1 = proj_w[:, :d_model]
    w2 = proj_w[:, d_model:]
    t_res = jnp.dot(emb_w.astype(jnp.float32), w1.T.astype(jnp.float32),
                    precision=jax.lax.Precision.HIGHEST)              # (nbin+1, d)
    t_chain = jnp.dot(emb_chain_w.astype(jnp.float32), w2.T.astype(jnp.float32),
                      precision=jax.lax.Precision.HIGHEST)            # (2, d)
    kpad = -(-(nbin + 3) // 128) * 128                                # lane-dense one-hot width
    table = jnp.zeros((kpad, d_model), jnp.float32)
    table = table.at[: nbin + 1].set(t_res)
    table = table.at[nbin + 1: nbin + 3].set(t_chain)

    # hi/lo bf16 split: table == t_hi + t_lo to ~2^-16 relative precision, so the kernel
    # can use two bf16 MXU passes instead of one (more expensive) f32 matmul.
    t_hi = table.astype(jnp.bfloat16)
    t_lo = (table - t_hi.astype(jnp.float32)).astype(jnp.bfloat16)

    # idx presented twice (free reshapes): lane-oriented (j axis) and sublane-oriented
    # (i axis) so the kernel never needs an in-kernel transpose.
    idx_row = idx.reshape(B, 1, L)
    idx_col = idx.reshape(B, L, 1)

    ti = _choose_row_tile(L, d_model)
    grid = (B, L // ti)

    kernel = _make_kernel(maxpos, nbin)
    # TODO(synk): for very large L * d_model also tile the j (column) axis so the output
    # block stays within the VMEM budget; unnecessary for typical sequence lengths.
    return pl.pallas_call(
        kernel,
        out_shape=jax.ShapeDtypeStruct((B, L, L, d_model), jnp.float32),
        grid_spec=pltpu.PrefetchScalarGridSpec(
            num_scalar_prefetch=0,
            grid=grid,
            in_specs=[
                pl.BlockSpec((1, 1, L), lambda b, t: (b, 0, 0)),        # idx (j axis), constant over t
                pl.BlockSpec((1, ti, 1), lambda b, t: (b, t, 0)),       # idx (i tile)
                pl.BlockSpec((1, ti, L), lambda b, t: (b, t, 0)),       # same_chain tile
                pl.BlockSpec((kpad, d_model), lambda b, t: (0, 0)),     # T_hi, never re-DMA'd
                pl.BlockSpec((kpad, d_model), lambda b, t: (0, 0)),     # T_lo, never re-DMA'd
            ],
            out_specs=pl.BlockSpec((1, ti, L, d_model), lambda b, t: (b, t, 0, 0)),
        ),
        compiler_params=pltpu.CompilerParams(
            dimension_semantics=("parallel", "parallel"),
            vmem_limit_bytes=32 * 1024 * 1024,
        ),
    )(idx_row, idx_col, same_chain, t_hi, t_lo)


if __name__ == "__main__":
    B, L, d_model = 2, 16, 32
    minpos, maxpos = -31, 31
    nbin = abs(minpos) + maxpos + 1          # 63

    key = jax.random.PRNGKey(0)
    k_idx, k_chain, k_emb, k_cemb, k_proj = jax.random.split(key, 5)

    idx = jax.random.randint(k_idx, (B, L), 0, 100, dtype=jnp.int32)
    same_chain = jax.random.randint(k_chain, (B, L, L), 0, 2, dtype=jnp.int32)

    # Synthetic parameters mirroring __init__ shapes:
    #   emb: Embedding(nbin+1, d_model), emb_chain: Embedding(2, d_model)  -> N(0,1)
    #   project: Linear(2*d_model, d_model, bias=False)
    emb_w = jax.random.normal(k_emb, (nbin + 1, d_model), dtype=jnp.float32)
    emb_chain_w = jax.random.normal(k_cemb, (2, d_model), dtype=jnp.float32)
    proj_w = jax.random.normal(k_proj, (d_model, 2 * d_model), dtype=jnp.float32) * (
        1.0 / jnp.sqrt(2.0 * d_model))

    out = positional_encoding_2d_forward(idx, same_chain, emb_w, emb_chain_w, proj_w,
                                         minpos=minpos, maxpos=maxpos)
    out = jax.block_until_ready(out)

    # Reference: literal translation of the PyTorch forward.
    seqsep = idx[:, None, :] - idx[:, :, None] + maxpos
    seqsep = jnp.clip(seqsep, 0, nbin - 1)
    seqsep = seqsep * same_chain + nbin * (1 - same_chain)
    emb_residx = jnp.take(emb_w, seqsep, axis=0)               # (B, L, L, d)
    emb_chain = jnp.take(emb_chain_w, same_chain, axis=0)      # (B, L, L, d)
    ref = jnp.einsum("bijk,ok->bijo",
                     jnp.concatenate([emb_residx, emb_chain], axis=-1),
                     proj_w, precision=jax.lax.Precision.HIGHEST)

    assert out.shape == (B, L, L, d_model)
    # Tolerance covers the regrouped projection + hi/lo bf16 table split (~2^-16 rel);
    # any indexing/logic error would show up as O(1) discrepancies.
    err = float(jnp.max(jnp.abs(out - ref)))
    assert jnp.allclose(out, ref, atol=1e-2, rtol=1e-2), f"max abs err {err}"

    print("KERNEL_OK")
</pallas_src>

<mosaic_0001>
module attributes {stable_mosaic.version = 11 : i64} {
  func.func @kernel(%arg0: i32, %arg1: i32, %arg2: memref<1x1x16xi32, #tpu.memory_space<vmem>>, %arg3: memref<1x16x1xi32, #tpu.memory_space<vmem>>, %arg4: memref<1x16x16xi32, #tpu.memory_space<vmem>>, %arg5: memref<128x32xbf16, #tpu.memory_space<vmem>>, %arg6: memref<128x32xbf16, #tpu.memory_space<vmem>>, %arg7: memref<1x16x16x32xf32, #tpu.memory_space<vmem>>) attributes {dimension_semantics = [#tpu.dimension_semantics<parallel>, #tpu.dimension_semantics<parallel>], iteration_bounds = array<i64: 2, 1>, scalar_prefetch = 0 : i64, scratch_operands = 0 : i64, tpu.core_type = #tpu.core_type<tc>, window_params = [{transform_indices = @transform_0, window_bounds = array<i64: 1, 1, 16>}, {transform_indices = @transform_1, window_bounds = array<i64: 1, 16, 1>}, {transform_indices = @transform_2, window_bounds = array<i64: 1, 16, 16>}, {pipeline_mode = #tpu.pipeline_mode<synchronous>, transform_indices = @transform_3, window_bounds = array<i64: 128, 32>}, {pipeline_mode = #tpu.pipeline_mode<synchronous>, transform_indices = @transform_4, window_bounds = array<i64: 128, 32>}, {transform_indices = @transform_5, window_bounds = array<i64: 1, 16, 16, 32>}]} {
    %c0 = arith.constant 0 : index
    %c0_0 = arith.constant 0 : index
    %c0_1 = arith.constant 0 : index
    %0 = vector.load %arg2[%c0, %c0_0, %c0_1] : memref<1x1x16xi32, #tpu.memory_space<vmem>>, vector<1x1x16xi32>
    %1 = vector.shape_cast %0 : vector<1x1x16xi32> to vector<1x16xi32>
    %c0_2 = arith.constant 0 : index
    %c0_3 = arith.constant 0 : index
    %c0_4 = arith.constant 0 : index
    %2 = vector.load %arg3[%c0_2, %c0_3, %c0_4] : memref<1x16x1xi32, #tpu.memory_space<vmem>>, vector<1x16x1xi32>
    %3 = vector.shape_cast %2 : vector<1x16x1xi32> to vector<16x1xi32>
    %c0_5 = arith.constant 0 : index
    %c0_6 = arith.constant 0 : index
    %c0_7 = arith.constant 0 : index
    %4 = vector.load %arg4[%c0_5, %c0_6, %c0_7] : memref<1x16x16xi32, #tpu.memory_space<vmem>>, vector<1x16x16xi32>
    %5 = vector.shape_cast %4 : vector<1x16x16xi32> to vector<16x16xi32>
    %6 = vector.broadcast %1 : vector<1x16xi32> to vector<16x16xi32>
    %7 = vector.broadcast %3 : vector<16x1xi32> to vector<16x16xi32>
    %8 = arith.subi %6, %7 : vector<16x16xi32>
    %c31_i32 = arith.constant 31 : i32
    %9 = vector.broadcast %c31_i32 : i32 to vector<16x16xi32>
    %10 = arith.addi %8, %9 : vector<16x16xi32>
    %c0_i32 = arith.constant 0 : i32
    %c62_i32 = arith.constant 62 : i32
    %11 = vector.broadcast %c0_i32 : i32 to vector<16x16xi32>
    %12 = arith.maxsi %11, %10 : vector<16x16xi32>
    %13 = vector.broadcast %c62_i32 : i32 to vector<16x16xi32>
    %14 = arith.minsi %13, %12 : vector<16x16xi32>
    %c0_i32_8 = arith.constant 0 : i32
    %15 = vector.broadcast %c0_i32_8 : i32 to vector<16x16xi32>
    %16 = arith.cmpi sgt, %5, %15 : vector<16x16xi32>
    %c63_i32 = arith.constant 63 : i32
    %17 = vector.broadcast %c63_i32 : i32 to vector<16x16xi32>
    %18 = arith.select %16, %14, %17 : vector<16x16xi1>, vector<16x16xi32>
    %19 = tpu.iota {dimensions = array<i32: 2>} : vector<16x16x128xi32>
    %20 = vector.shape_cast %18 : vector<16x16xi32> to vector<16x16x1xi32>
    %21 = vector.broadcast %20 : vector<16x16x1xi32> to vector<16x16x128xi32>
    %22 = arith.cmpi eq, %19, %21 : vector<16x16x128xi32>
    %23 = vector.shape_cast %5 : vector<16x16xi32> to vector<16x16x1xi32>
    %c64_i32 = arith.constant 64 : i32
    %24 = vector.broadcast %c64_i32 : i32 to vector<16x16x1xi32>
    %25 = arith.addi %23, %24 : vector<16x16x1xi32>
    %26 = vector.broadcast %25 : vector<16x16x1xi32> to vector<16x16x128xi32>
    %27 = arith.cmpi eq, %19, %26 : vector<16x16x128xi32>
    %28 = arith.ori %22, %27 : vector<16x16x128xi1>
    %29 = arith.extui %28 : vector<16x16x128xi1> to vector<16x16x128xi32>
    %30 = arith.sitofp %29 : vector<16x16x128xi32> to vector<16x16x128xf32>
    %31 = arith.truncf %30 : vector<16x16x128xf32> to vector<16x16x128xbf16>
    %32 = vector.shape_cast %31 : vector<16x16x128xbf16> to vector<256x128xbf16>
    %c0_9 = arith.constant 0 : index
    %c0_10 = arith.constant 0 : index
    %33 = vector.load %arg5[%c0_9, %c0_10] : memref<128x32xbf16, #tpu.memory_space<vmem>>, vector<128x32xbf16>
    %cst = arith.constant dense<0.000000e+00> : vector<256x32xf32>
    %34 = tpu.matmul %32, %33, %cst {dimension_numbers = #tpu.dot_dimension_numbers<[1], [0], [0], [1], [0, 0, 1, 1], [], []>} : vector<256x128xbf16>, vector<128x32xbf16>, vector<256x32xf32> -> vector<256x32xf32>
    %c0_11 = arith.constant 0 : index
    %c0_12 = arith.constant 0 : index
    %35 = vector.load %arg6[%c0_11, %c0_12] : memref<128x32xbf16, #tpu.memory_space<vmem>>, vector<128x32xbf16>
    %cst_13 = arith.constant dense<0.000000e+00> : vector<256x32xf32>
    %36 = tpu.matmul %32, %35, %cst_13 {dimension_numbers = #tpu.dot_dimension_numbers<[1], [0], [0], [1], [0, 0, 1, 1], [], []>} : vector<256x128xbf16>, vector<128x32xbf16>, vector<256x32xf32> -> vector<256x32xf32>
    %37 = arith.addf %34, %36 : vector<256x32xf32>
    %38 = vector.shape_cast %37 : vector<256x32xf32> to vector<16x16x32xf32>
    %c0_14 = arith.constant 0 : index
    %c0_15 = arith.constant 0 : index
    %c0_16 = arith.constant 0 : index
    %c0_17 = arith.constant 0 : index
    %39 = vector.load %arg7[%c0_14, %c0_15, %c0_16, %c0_17] : memref<1x16x16x32xf32, #tpu.memory_space<vmem>>, vector<1x16x16x32xf32>
    %40 = vector.shape_cast %39 : vector<1x16x16x32xf32> to vector<16x16x32xf32>
    %41 = vector.shape_cast %38 : vector<16x16x32xf32> to vector<1x16x16x32xf32>
    tpu.vector_store %arg7[%c0_14, %c0_15, %c0_16, %c0_17], %41 {strides = array<i32>} : memref<1x16x16x32xf32, #tpu.memory_space<vmem>>, vector<1x16x16x32xf32>,
    return
  }
  func.func @transform_0(%arg0: i32, %arg1: i32) -> (i32, i32, i32) {
    %c0_i32 = arith.constant 0 : i32
    %c0_i32_0 = arith.constant 0 : i32
    %c0_i32_1 = arith.constant 0 : i32
    return %arg0, %c0_i32, %c0_i32_0 : i32, i32, i32
  }
  func.func @transform_1(%arg0: i32, %arg1: i32) -> (i32, i32, i32) {
    %c0_i32 = arith.constant 0 : i32
    %c0_i32_0 = arith.constant 0 : i32
    return %arg0, %arg1, %c0_i32 : i32, i32, i32
  }
  func.func @transform_2(%arg0: i32, %arg1: i32) -> (i32, i32, i32) {
    %c0_i32 = arith.constant 0 : i32
    %c0_i32_0 = arith.constant 0 : i32
    return %arg0, %arg1, %c0_i32 : i32, i32, i32
  }
  func.func @transform_3(%arg0: i32, %arg1: i32) -> (i32, i32) {
    %c0_i32 = arith.constant 0 : i32
    %c0_i32_0 = arith.constant 0 : i32
    %c0_i32_1 = arith.constant 0 : i32
    return %c0_i32, %c0_i32_0 : i32, i32
  }
  func.func @transform_4(%arg0: i32, %arg1: i32) -> (i32, i32) {
    %c0_i32 = arith.constant 0 : i32
    %c0_i32_0 = arith.constant 0 : i32
    %c0_i32_1 = arith.constant 0 : i32
    return %c0_i32, %c0_i32_0 : i32, i32
  }
  func.func @transform_5(%arg0: i32, %arg1: i32) -> (i32, i32, i32, i32) {
    %c0_i32 = arith.constant 0 : i32
    %c0_i32_0 = arith.constant 0 : i32
    %c0_i32_1 = arith.constant 0 : i32
    return %arg0, %arg1, %c0_i32, %c0_i32_0 : i32, i32, i32, i32
  }
}

</mosaic_0001>

<bundles_post_ra>
// kernel: tpu_custom_call.1
= control target key start
LH: loop header
LB: loop body
LE: loop exit
PB: predicated region body
PF: predicated region fallthrough
CT: control target
= control target key end

     0   :  { %10 = vsyncpa [#allocation3], 0  ;;  %s2510_s0 = inlined_call_operand.vmem [shape: s32[2,1,16], index: 0, kind: input, shape index: {}]   ;;  %s2511_s1 = inlined_call_operand.vmem [shape: s32[2,16,1], index: 1, kind: input, shape index: {}]   ;;  %s2512_s2 = inlined_call_operand.vmem [shape: s32[2,16,16], index: 2, kind: input, shape index: {}]   ;;  %s2513_s3 = inlined_call_operand.vmem [shape: bf16[128,32], index: 3, kind: input, shape index: {}]   ;;  %s2514_s4 = inlined_call_operand.vmem [shape: bf16[128,32], index: 4, kind: input, shape index: {}]   ;;  %s2515_s5 = inlined_call_operand.hbm [shape: f32[2,16,16,32], index: 5, kind: output, shape index: {}]  }
   0x1   :  { %12 = vsyncpa [#allocation3 + $0x1], 0  ;;  %s2002_s18 = smov 0   ;;  %s2004_s19 = smov 0  }
   0x2   :  { %s2006_s20 = smov 0   ;;  %s2008_s21 = smov 0  }
   0x3   :  { %s2010_s22 = smov 0   ;;  %s2012_s23 = smov 0  }
   0x4 LB: > { %s1504_s24 = sadd.s32 4294967295, %s1965_s23   ;;  %s1505_s25 = sadd.s32 4294967294, %s1965_s23   ;;  %s1965_s23 = sphi %s2012_s23, %s18_s23   ;;  %s1961_s22 = sphi %s2010_s22, %s2522_s22   ;;  %s1957_s21 = sphi %s2008_s21, %s2521_s21   ;;  %s1953_s20 = sphi %s2006_s20, %s2520_s20   ;;  %s1949_s19 = sphi %s2004_s19, %s2519_s19   ;;  %s1945_s18 = sphi %s2002_s18, %s2518_s18  }
   0x5   : > { %s30_s26 = sadd.s32 1, %s1961_s22  ;;  %s163_s27 = sadd.s32 1, %s1953_s20 }
   0x6   : > { %p32_p0 = scmp.ge.s32.totalorder %s30_s26, 2  ;;  %p173_p1 = scmp.ne.s32.totalorder %s1953_s20, %s1949_s19 }
   0x7   : > { %p174_p2 = scmp.eq.s32.totalorder %s1504_s24, 1  ;;  %p179_p3 = scmp.ne.s32.totalorder %s1949_s19, %s1945_s18 }
   0x8   : > { %s2524_s26 = smov (%p32_p0, %s30_s26), 0  ;;  %p180_p5 = scmp.eq.s32.totalorder %s1505_s25, 1 }
   0x9   : > { %p2042_p4 = por %p174_p2, %p173_p1  ;;  %s158_s29 = ssub.s32 %s1961_s22, %s2524_s26 }
   0xa   : > { %p1508_p6 = scmp.ge.s32.totalorder %s1965_s23, 1  ;;  %p161_p7 = scmp.eq.s32.totalorder %s158_s29, 0 }
   0xb   : > { %p2049_p8 = por %p180_p5, %p179_p3  ;;  %p236_p9 = scmp.lt.s32.totalorder %s1965_s23, 3 }
   0xc   : > { %s2055_s6 = scalar_select %p161_p7, %s1953_s20, %s163_s27  }
   0xd   : > { %p237_p10 = pnand %p1508_p6, %p236_p9 }
   0xe   : > { %p280_p11 = scmp.lt.s32.totalorder (!%p237_p10), %s1957_s21, 1  ;;  %v336_v0 = vlaneseq (!%p237_p10)  ;;  %v1967_v1 = vmov (!%p237_p10), 0   ;;  %v1871_v31 = vld [vmem:[%s2514_s4] sm:$0xff] (!%p237_p10)   ;;  %v1873_v33 = vld [vmem:[%s2514_s4 + $0x8] sm:$0xff] (!%p237_p10)   ;;  %v1875_v35 = vld [vmem:[%s2514_s4 + $0x10] sm:$0xff] (!%p237_p10)   ;;  %s1634_s10 = sshll.u32 (!%p237_p10), %s1957_s21, 12 }
   0xf   : > { %240 = sbr.rel (%p237_p10) target bundleno = 577 (0x241), region = 40  ;;  %1870 = vset.pattern.permute.xlu0 (!%p237_p10), %v1967_v1  ;;  %v1872_v32 = vld [vmem:[%s2513_s3] sm:$0xff] (!%p237_p10)   ;;  %v1874_v34 = vld [vmem:[%s2513_s3 + $0x8] sm:$0xff] (!%p237_p10)   ;;  %1683 = vmatprep.subr.bf16.mxu1 (!%p237_p10), %v1871_v31  ;;  %v1876_v36 = vld [vmem:[%s2513_s3 + $0x10] sm:$0xff] (!%p237_p10)   ;;  %s1969_s16 = smov (!%p237_p10), [#allocation2]  }
  0x10   : > { %v339_v2 = vshrl.u32 (!%p237_p10), %v336_v0, 7  ;;  %1731 = vmatprep.subr.bf16.mxu0 (!%p237_p10), %v1872_v32  ;;  %1684 = vmatpush3.bf16.msra.mxu1 (!%p237_p10), %v1871_v31  ;;  %v1877_v37 = vld [vmem:[%s2514_s4 + $0x18] sm:$0xff] (!%p237_p10)   ;;  %v1879_v39 = vld [vmem:[%s2514_s4 + $0x20] sm:$0xff] (!%p237_p10)   ;;  %v1881_v41 = vld [vmem:[%s2514_s4 + $0x28] sm:$0xff] (!%p237_p10)   ;;  %v2168_v45 = vand.u32 (!%p237_p10), 127, %v336_v0 }
  0x11   : > { %1732 = vmatpush3.bf16.msra.mxu0 (!%p237_p10), %v1872_v32  ;;  %1685 = vmatprep.subr.bf16.mxu1 (!%p237_p10), %v1873_v33  ;;  %v1878_v38 = vld [vmem:[%s2513_s3 + $0x18] sm:$0xff] (!%p237_p10)   ;;  %v1880_v40 = vld [vmem:[%s2513_s3 + $0x20] sm:$0xff] (!%p237_p10)   ;;  %v1882_v42 = vld [vmem:[%s2513_s3 + $0x28] sm:$0xff] (!%p237_p10)  }
  0x12   : > { %v2063_v3 = vsub.s32 (!%p237_p10), 0, %v339_v2  ;;  %v2078_v8 = vsub.s32 (!%p237_p10), 1, %v339_v2  ;;  %v2080_v9 = vsub.s32 (!%p237_p10), 2, %v339_v2  ;;  %v2086_v12 = vsub.s32 (!%p237_p10), 3, %v339_v2  ;;  %1733 = vmatprep.subr.bf16.mxu0 (!%p237_p10), %v1874_v34  ;;  %v1883_v43 = vld [vmem:[%s2514_s4 + $0x30] sm:$0xff] (!%p237_p10)   ;;  %v1885_v49 = vld [vmem:[%s2514_s4 + $0x38] sm:$0xff] (!%p237_p10)  }
  0x13   : > { %v2090_v14 = vsub.s32 (!%p237_p10), 4, %v339_v2  ;;  %v2094_v16 = vsub.s32 (!%p237_p10), 5, %v339_v2  ;;  %v2098_v18 = vsub.s32 (!%p237_p10), 6, %v339_v2  ;;  %v2102_v20 = vsub.s32 (!%p237_p10), 7, %v339_v2  ;;  %v1884_v44 = vld [vmem:[%s2513_s3 + $0x30] sm:$0xff] (!%p237_p10)   ;;  %v1886_v50 = vld [vmem:[%s2513_s3 + $0x38] sm:$0xff] (!%p237_p10)  }
  0x14   : > { %1686 = vmatpush3.bf16.msra.mxu1 (!%p237_p10), %v1873_v33 }
  0x15   : > { %1734 = vmatpush3.bf16.msra.mxu0 (!%p237_p10), %v1874_v34  ;;  %1687 = vmatprep.subr.bf16.mxu1 (!%p237_p10), %v1875_v35 }
  0x16   : > { %s2059_s7 = scalar_select %p280_p11, %s1957_s21, 1  ;;  %1735 = vmatprep.subr.bf16.mxu0 %v1876_v36 }
  0x17   : > { %s2452_s21 = scalar_lea.hbm %s2515_s5, %s1634_s10 }
  0x18   : > { %s1632_s8 = sshll.u32 %s2059_s7, 4  ;;  %1688 = vmatpush3.bf16.msra.mxu1 %v1875_v35  ;;  %s282_s17 = scalar_lea.vmem %s2510_s0, %s2059_s7 }
  0x19   : > { %s291_s11 = scalar_lea.vmem %s2511_s1, %s1632_s8  ;;  %s2071_s14 = scalar_lea.vmem %s2512_s2, %s1632_s8  ;;  %1736 = vmatpush3.bf16.msra.mxu0 %v1876_v36  ;;  %1689 = vmatprep.subr.bf16.mxu1 %v1877_v37  ;;  %v1514_v48 = vld [vmem:[%s282_s17] ss:$0 sm:$0xff] }
  0x1a   : > { %v306_v4 = vld [vmem:[%s291_s11] sm:$0xff]  ;;  %v307_v6 = vld [vmem:[%s291_s11 + $0x8] sm:$0xff]  ;;  %1737 = vmatprep.subr.bf16.mxu0 %v1878_v38  ;;  %s277_s7 = sand.u32 1, %s1949_s19   ;;  %s1891_s17 = sshll.u32 %s1969_s16, 4  ;;  %s1892_s17 = int_to_ptr.vmem [resolvable:$false] %s1891_s17 }
  0x1b   : > { %v2074_v5 = vld [vmem:[%s2071_s14] sm:$0xff]  ;;  %315 = vperm.xlu0 %1870, %v306_v4   ;;  %v2107_v22 = vld [vmem:[%s2071_s14 + $0x8] sm:$0xff]  ;;  %s1509_s8 = sshll.u32 %s277_s7, 8  ;;  %s2464_s14 = scalar_lea.sflag [#allocation3], %s277_s7 }
  0x1c   : > { %v549_v7 = vrot.slane %v2074_v5, %v2063_v3  ;;  %v560_v10 = vrot.slane %v2074_v5, %v2078_v8  ;;  %v571_v11 = vrot.slane %v2074_v5, %v2080_v9  ;;  %v582_v13 = vrot.slane %v2074_v5, %v2086_v12  ;;  %1690 = vmatpush3.bf16.msra.mxu1 %v1877_v37  ;;  %s2387_s9 = scalar_lea.vmem [#allocation2], %s1509_s8  ;;  %s1893_s24 = scalar_lea.vmem %s1892_s17, 8192 }
  0x1d   : > { %v593_v15 = vrot.slane %v2074_v5, %v2090_v14  ;;  %v604_v17 = vrot.slane %v2074_v5, %v2094_v16  ;;  %v615_v19 = vrot.slane %v2074_v5, %v2098_v18  ;;  %v626_v21 = vrot.slane %v2074_v5, %v2102_v20  ;;  %1738 = vmatpush3.bf16.msra.mxu0 %v1878_v38  ;;  %s1398_s11 = sshll.u32 %s2387_s9, 4  ;;  %s2454_s11 = int_to_ptr.vmem [resolvable:$true] %s1398_s11 }
  0x1e   : > { %551 = vbcast.lane.b32.xlu1 %v549_v7, 256  ;;  %v637_v23 = vrot.slane %v2107_v22, %v2063_v3  ;;  %v648_v24 = vrot.slane %v2107_v22, %v2078_v8  ;;  %v659_v25 = vrot.slane %v2107_v22, %v2080_v9  ;;  %v670_v26 = vrot.slane %v2107_v22, %v2086_v12  ;;  %s1887_s15 = scalar_lea.vmem %s2454_s11, 4096  ;;  %p1894_p1 = scmp.lt.s32.totalorder %s2454_s11, %s1892_s17 }
  0x1f   : > { %318 = vperm.xlu0 %1870, %v307_v6   ;;  %v681_v27 = vrot.slane %v2107_v22, %v2090_v14  ;;  %v692_v28 = vrot.slane %v2107_v22, %v2094_v16  ;;  %v703_v29 = vrot.slane %v2107_v22, %v2098_v18  ;;  %v714_v30 = vrot.slane %v2107_v22, %v2102_v20  ;;  %p1888_p12 = scmp.ne.s32.totalorder %s2454_s11, %s1887_s15  ;;  %p1895_p2 = scmp.lt.s32.totalorder %s1893_s24, %s1887_s15 }
  0x20   : > { %1691 = vmatprep.subr.bf16.mxu1 %v1879_v39  ;;  %1739 = vmatprep.subr.bf16.mxu0 %v1880_v40  ;;  %vm332_vm2 = vcmp.gt.s32.totalorder %v2074_v5, 0  ;;  %vm333_vm5 = vcmp.gt.s32.totalorder %v2107_v22, 0 }
  0x21   : > { %1692 = vmatpush3.bf16.msra.mxu1 %v1879_v39  ;;  %1740 = vmatpush3.bf16.msra.mxu0 %v1880_v40  ;;  %p1889_p13 = pnand %p1888_p12, %p2042_p4  ;;  %p1896_p3 = por %p1895_p2, %p1894_p1 }
  0x22   : > { %555 = vbcast.lane.b32.xlu1 %v549_v7, 264  ;;  %1693 = vmatprep.subr.bf16.mxu1 %v1881_v41 }
  0x23   : > { %562 = vbcast.lane.b32.xlu0 %v560_v10, 256  ;;  %1741 = vmatprep.subr.bf16.mxu0 %v1882_v42  ;;  %p1890_p0 = pneg %p1889_p13 }
  0x25   : > { %1694 = vmatpush3.bf16.msra.mxu1 %v1881_v41  ;;  %1742 = vmatpush3.bf16.msra.mxu0 %v1882_v42  ;;  %p1897_p5 = pnand %p1896_p3, %p1890_p0 }
  0x26   : > { %566 = vbcast.lane.b32.xlu1 %v560_v10, 264  ;;  %1695 = vmatprep.subr.bf16.mxu1 %v1883_v43 }
  0x27   : > { %573 = vbcast.lane.b32.xlu0 %v571_v11, 256  ;;  %1743 = vmatprep.subr.bf16.mxu0 %v1884_v44 }
  0x29   : > { %1696 = vmatpush3.bf16.msra.mxu1 %v1883_v43  ;;  %1744 = vmatpush3.bf16.msra.mxu0 %v1884_v44 }
  0x2a   : > { %577 = vbcast.lane.b32.xlu1 %v571_v11, 264  ;;  %1697 = vmatprep.subr.bf16.mxu1 %v1885_v49 }
  0x2b   : > { %584 = vbcast.lane.b32.xlu0 %v582_v13, 256  ;;  %1745 = vmatprep.subr.bf16.mxu0 %v1886_v50 }
  0x2d   : > { %1698 = vmatpush3.bf16.msra.mxu1 %v1885_v49  ;;  %1746 = vmatpush3.bf16.msra.mxu0 %v1886_v50 }
  0x2e   : > { %588 = vbcast.lane.b32.xlu1 %v582_v13, 264 }
  0x2f   : > { %595 = vbcast.lane.b32.xlu0 %v593_v15, 256 }
  0x32   : > { %599 = vbcast.lane.b32.xlu1 %v593_v15, 264 }
  0x33   : > { %606 = vbcast.lane.b32.xlu0 %v604_v17, 256 }
  0x36   : > { %610 = vbcast.lane.b32.xlu1 %v604_v17, 264 }
  0x37   : > { %617 = vbcast.lane.b32.xlu0 %v615_v19, 256 }
  0x3a   : > { %621 = vbcast.lane.b32.xlu1 %v615_v19, 264 }
  0x3b   : > { %628 = vbcast.lane.b32.xlu0 %v626_v21, 256 }
  0x3e   : > { %632 = vbcast.lane.b32.xlu1 %v626_v21, 264 }
  0x3f   : > { %639 = vbcast.lane.b32.xlu0 %v637_v23, 256 }
  0x42   : > { %643 = vbcast.lane.b32.xlu1 %v637_v23, 264 }
  0x43   : > { %650 = vbcast.lane.b32.xlu0 %v648_v24, 256 }
  0x46   : > { %654 = vbcast.lane.b32.xlu1 %v648_v24, 264 }
  0x47   : > { %661 = vbcast.lane.b32.xlu0 %v659_v25, 256 }
  0x4a   : > { %665 = vbcast.lane.b32.xlu1 %v659_v25, 264 }
  0x4b   : > { %672 = vbcast.lane.b32.xlu0 %v670_v26, 256 }
  0x4e   : > { %676 = vbcast.lane.b32.xlu1 %v670_v26, 264 }
  0x4f   : > { %683 = vbcast.lane.b32.xlu0 %v681_v27, 256 }
  0x52   : > { %687 = vbcast.lane.b32.xlu1 %v681_v27, 264 }
  0x53   : > { %694 = vbcast.lane.b32.xlu0 %v692_v28, 256 }
  0x56   : > { %698 = vbcast.lane.b32.xlu1 %v692_v28, 264 }
  0x57   : > { %705 = vbcast.lane.b32.xlu0 %v703_v29, 256 }
  0x5a   : > { %709 = vbcast.lane.b32.xlu1 %v703_v29, 264 }
  0x5b   : > { %716 = vbcast.lane.b32.xlu0 %v714_v30, 256 }
  0x5e   : > { %720 = vbcast.lane.b32.xlu1 %v714_v30, 264 }
  0x90   : > { %v552_v46 = vpop.permute.xlu1 %551 }
  0x91   : > { %v2170_v47 = vadd.s32 64, %v552_v46 }
  0x93   : > { %vm754_vm0 = vcmp.eq.s32.totalorder %v2168_v45, %v2170_v47 }
  0x94   : > { %v556_v6 = vpop.permute.xlu1 %555 }
  0x98   : > { %v567_v10 = vpop.permute.xlu1 %566 }
  0x9a   : > { %v316_v51 = vpop.permute.xlu0 %315 }
  0x9b   : > { %v320_v52 = vsub.s32 %v1514_v48, %v316_v51  ;;  %v725_v51 = vadd.s32 64, %v567_v10 }
  0x9c   : > { %v2195_v17 = vpop.permute.xlu1 %577 }
  0x9d   : > { %v322_v53 = vadd.s32 31, %v320_v52  ;;  %vm757_vm13 = vcmp.eq.s32.totalorder %v2168_v45, %v725_v51 }
  0x9e   : > { %v319_v54 = vpop.permute.xlu0 %318 }
  0x9f   : > { %vm324_vm1 = vcmp.gt.s32.totalorder %v322_v53, 0  ;;  %v321_v55 = vsub.s32 %v1514_v48, %v319_v54  ;;  %v723_v48 = vadd.s32 64, %v556_v6 }
  0xa0   : > { %v325_v56 = vsel %vm324_vm1, %v322_v53, 0  ;;  %v2200_v22 = vpop.permute.xlu1 %588 }
  0xa1   : > { %vm328_vm3 = vcmp.lt.s32.totalorder %v325_v56, 62  ;;  %v323_v57 = vadd.s32 31, %v321_v55  ;;  %vm755_vm9 = vcmp.eq.s32.totalorder %v2168_v45, %v723_v48  ;;  %v727_v55 = vadd.s32 64, %v2195_v17 }
  0xa2   : > { %v329_v58 = vsel %vm328_vm3, %v325_v56, 62  ;;  %v563_v11 = vpop.permute.xlu0 %562  ;;  %v1968_v56 = vmov 1.0|1.0  }
  0xa3   : > { %v334_v59 = vsel %vm332_vm2, %v329_v58, 63  ;;  %vm326_vm4 = vcmp.gt.s32.totalorder %v323_v57, 0  ;;  %v724_v52 = vadd.s32 64, %v563_v11 }
  0xa4   : > { %v327_v60 = vsel %vm326_vm4, %v323_v57, 0  ;;  %v341_v61 = vrot.slane %v334_v59, %v2063_v3  ;;  %v352_v0 = vrot.slane %v334_v59, %v2078_v8  ;;  %v363_v1 = vrot.slane %v334_v59, %v2080_v9  ;;  %v2206_v25 = vpop.permute.xlu1 %599 }
  0xa5   : > { %vm330_vm6 = vcmp.lt.s32.totalorder %v327_v60, 62  ;;  %v374_v2 = vrot.slane %v334_v59, %v2086_v12  ;;  %v385_v4 = vrot.slane %v334_v59, %v2090_v14  ;;  %v396_v5 = vrot.slane %v334_v59, %v2094_v16 }
  0xa6   : > { %v331_v62 = vsel %vm330_vm6, %v327_v60, 62  ;;  %347 = vbcast.lane.b32.xlu1 %v341_v61, 264  ;;  %343 = vbcast.lane.b32.xlu0 %v341_v61, 256  ;;  %v407_v7 = vrot.slane %v334_v59, %v2098_v18  ;;  %v418_v13 = vrot.slane %v334_v59, %v2102_v20  ;;  %v2197_v19 = vpop.permute.xlu0 %573  ;;  %vm756_vm1 = vcmp.eq.s32.totalorder %v2168_v45, %v724_v52 }
  0xa7   : > { %v335_v63 = vsel %vm333_vm5, %v331_v62, 63  ;;  %v726_v47 = vadd.s32 64, %v2197_v19  ;;  %v729_v59 = vadd.s32 64, %v2200_v22  ;;  %vm759_vm4 = vcmp.eq.s32.totalorder %v2168_v45, %v727_v55 }
  0xa8   : > { %v429_v15 = vrot.slane %v335_v63, %v2063_v3  ;;  %v440_v21 = vrot.slane %v335_v63, %v2078_v8  ;;  %v451_v24 = vrot.slane %v335_v63, %v2080_v9  ;;  %v462_v3 = vrot.slane %v335_v63, %v2086_v12  ;;  %v2211_v27 = vpop.permute.xlu1 %610 }
  0xa9   : > { %v473_v8 = vrot.slane %v335_v63, %v2090_v14  ;;  %v484_v9 = vrot.slane %v335_v63, %v2094_v16  ;;  %v495_v12 = vrot.slane %v335_v63, %v2098_v18  ;;  %v506_v14 = vrot.slane %v335_v63, %v2102_v20 }
  0xaa   : > { %358 = vbcast.lane.b32.xlu1 %v352_v0, 264  ;;  %354 = vbcast.lane.b32.xlu0 %v352_v0, 256  ;;  %v2202_v23 = vpop.permute.xlu0 %584  ;;  %v731_v63 = vadd.s32 64, %v2206_v25 }
  0xab   : > { %v728_v60 = vadd.s32 64, %v2202_v23 }
  0xac   : > { %v2217_v29 = vpop.permute.xlu1 %621 }
  0xad   : > { %v735_v10 = vadd.s32 64, %v2217_v29 }
  0xae   : > { %369 = vbcast.lane.b32.xlu1 %v363_v1, 264  ;;  %365 = vbcast.lane.b32.xlu0 %v363_v1, 256  ;;  %v2208_v26 = vpop.permute.xlu0 %595 }
  0xaf   : > { %v730_v0 = vadd.s32 64, %v2208_v26 }
  0xb0   : > { %v2222_v31 = vpop.permute.xlu1 %632 }
  0xb1   : > { %v737_v17 = vadd.s32 64, %v2222_v31 }
  0xb2   : > { %380 = vbcast.lane.b32.xlu1 %v374_v2, 264  ;;  %376 = vbcast.lane.b32.xlu0 %v374_v2, 256  ;;  %v2213_v28 = vpop.permute.xlu0 %606 }
  0xb4   : > { %v2226_v33 = vpop.permute.xlu1 %643 }
  0xb5   : > { %v739_v23 = vadd.s32 64, %v2226_v33 }
  0xb6   : > { %391 = vbcast.lane.b32.xlu1 %v385_v4, 264  ;;  %387 = vbcast.lane.b32.xlu0 %v385_v4, 256  ;;  %v2219_v30 = vpop.permute.xlu0 %617  ;;  %v733_v4 = vadd.s32 64, %v2211_v27 }
  0xb7   : > { %v734_v11 = vadd.s32 64, %v2219_v30 }
  0xb8   : > { %v2230_v34 = vpop.permute.xlu1 %654 }
  0xb9   : > { %v741_v26 = vadd.s32 64, %v2230_v34 }
  0xba   : > { %402 = vbcast.lane.b32.xlu1 %v396_v5, 264  ;;  %398 = vbcast.lane.b32.xlu0 %v396_v5, 256  ;;  %v2224_v32 = vpop.permute.xlu0 %628  ;;  %v732_v5 = vadd.s32 64, %v2213_v28 }
  0xbb   : > { %v736_v19 = vadd.s32 64, %v2224_v32 }
  0xbc   : > { %v2234_v35 = vpop.permute.xlu1 %665 }
  0xbe   : > { %413 = vbcast.lane.b32.xlu1 %v407_v7, 264  ;;  %409 = vbcast.lane.b32.xlu0 %v407_v7, 256  ;;  %v2228_v16 = vpop.permute.xlu0 %639 }
  0xc0   : > { %v2238_v37 = vpop.permute.xlu1 %676 }
  0xc2   : > { %424 = vbcast.lane.b32.xlu1 %v418_v13, 264  ;;  %420 = vbcast.lane.b32.xlu0 %v418_v13, 256  ;;  %v2232_v18 = vpop.permute.xlu0 %650 }
  0xc4   : > { %v2242_v38 = vpop.permute.xlu1 %687 }
  0xc6   : > { %435 = vbcast.lane.b32.xlu1 %v429_v15, 264  ;;  %431 = vbcast.lane.b32.xlu0 %v429_v15, 256  ;;  %v2236_v36 = vpop.permute.xlu0 %661 }
  0xc8   : > { %v2246_v40 = vpop.permute.xlu1 %698 }
  0xca   : > { %446 = vbcast.lane.b32.xlu1 %v440_v21, 264  ;;  %442 = vbcast.lane.b32.xlu0 %v440_v21, 256  ;;  %v2240_v20 = vpop.permute.xlu0 %672 }
  0xcb   : > { %v744_v31 = vadd.s32 64, %v2240_v20 }
  0xcc   : > { %v2250_v42 = vpop.permute.xlu1 %709 }
  0xce   : > { %457 = vbcast.lane.b32.xlu1 %v451_v24, 264  ;;  %453 = vbcast.lane.b32.xlu0 %v451_v24, 256  ;;  %v2244_v39 = vpop.permute.xlu0 %683  ;;  %v738_v24 = vadd.s32 64, %v2228_v16  ;;  %v747_v16 = vadd.s32 64, %v2242_v38 }
  0xcf   : > { %v746_v34 = vadd.s32 64, %v2244_v39  ;;  %v751_v39 = vadd.s32 64, %v2250_v42 }
  0xd0   : > { %v2254_v44 = vpop.permute.xlu1 %720 }
  0xd1   : > { %v753_v42 = vadd.s32 64, %v2254_v44 }
  0xd2   : > { %468 = vbcast.lane.b32.xlu1 %v462_v3, 264  ;;  %464 = vbcast.lane.b32.xlu0 %v462_v3, 256  ;;  %v2248_v41 = vpop.permute.xlu0 %694 }
  0xd6   : > { %479 = vbcast.lane.b32.xlu1 %v473_v8, 264  ;;  %475 = vbcast.lane.b32.xlu0 %v473_v8, 256  ;;  %v2252_v43 = vpop.permute.xlu0 %705  ;;  %v740_v8 = vadd.s32 64, %v2232_v18 }
  0xda   : > { %490 = vbcast.lane.b32.xlu1 %v484_v9, 264  ;;  %486 = vbcast.lane.b32.xlu0 %v484_v9, 256  ;;  %v2256_v46 = vpop.permute.xlu0 %716  ;;  %v743_v9 = vadd.s32 64, %v2234_v35 }
  0xde   : > { %501 = vbcast.lane.b32.xlu1 %v495_v12, 264  ;;  %497 = vbcast.lane.b32.xlu0 %v495_v12, 256  ;;  %v742_v12 = vadd.s32 64, %v2236_v36  ;;  %v749_v36 = vadd.s32 64, %v2246_v40  ;;  %v750_v40 = vadd.s32 64, %v2252_v43  ;;  %v752_v43 = vadd.s32 64, %v2256_v46 }
  0xe2   : > { %512 = vbcast.lane.b32.xlu1 %v506_v14, 264  ;;  %508 = vbcast.lane.b32.xlu0 %v506_v14, 256  ;;  %v745_v14 = vadd.s32 64, %v2238_v37  ;;  %v748_v37 = vadd.s32 64, %v2248_v41 }
 0x118   : > { %v348_v49 = vpop.permute.xlu1 %347  ;;  %v344_v50 = vpop.permute.xlu0 %343 }
 0x119   : > { %vm515_vm7 = vcmp.eq.s32.totalorder %v2168_v45, %v348_v49  ;;  %vm514_vm8 = vcmp.eq.s32.totalorder %v2168_v45, %v344_v50 }
 0x11a   : > { %vm786_vm10 = vmor %vm514_vm8, %vm754_vm0  ;;  %vm758_vm8 = vcmp.eq.s32.totalorder %v2168_v45, %v726_v47 }
 0x11b   : > { %vm787_vm11 = vmor %vm515_vm7, %vm755_vm9 }
 0x11c   : > { %v359_v53 = vpop.permute.xlu1 %358  ;;  %vm1555_vm12 = vmpackc.low %vm787_vm11, %vm786_vm10  ;;  %v355_v54 = vpop.permute.xlu0 %354  ;;  %vm761_vm11 = vcmp.eq.s32.totalorder %v2168_v45, %v729_v59 }
 0x11d   : > { %vm517_vm14 = vcmp.eq.s32.totalorder %v2168_v45, %v359_v53  ;;  %1699 = vmatprep.mubr.msk.bf16.mxu1 %vm1555_vm12, %v1968_v56  ;;  %1747 = vmatprep.mubr.msk.bf16.mxu0 %vm1555_vm12, %v1968_v56  ;;  %vm516_vm15 = vcmp.eq.s32.totalorder %v2168_v45, %v355_v54 }
 0x11e   : > { %vm789_vm0 = vmor %vm517_vm14, %vm757_vm13 }
 0x11f   : > { %vm788_vm2 = vmor %vm516_vm15, %vm756_vm1  ;;  %vm760_vm15 = vcmp.eq.s32.totalorder %v2168_v45, %v728_v60 }
 0x120   : > { %vm1557_vm3 = vmpackc.low %vm789_vm0, %vm788_vm2  ;;  %v370_v57 = vpop.permute.xlu1 %369  ;;  %v366_v58 = vpop.permute.xlu0 %365  ;;  %vm763_vm2 = vcmp.eq.s32.totalorder %v2168_v45, %v731_v63 }
 0x121   : > { %vm519_vm5 = vcmp.eq.s32.totalorder %v2168_v45, %v370_v57  ;;  %1700 = vmatmul.mubr.msk.bf16.vlgmr.msra.gmra.mrb[0].mxu1 %vm1557_vm3, %v1968_v56  ;;  %1748 = vmatmul.mubr.msk.bf16.vlgmr.msra.gmra.mrb[0].mxu0 %vm1557_vm3, %v1968_v56  ;;  %vm518_vm6 = vcmp.eq.s32.totalorder %v2168_v45, %v366_v58 }
 0x122   : > { %vm791_vm7 = vmor %vm519_vm5, %vm759_vm4 }
 0x123   : > { %vm790_vm9 = vmor %vm518_vm6, %vm758_vm8  ;;  %vm762_vm6 = vcmp.eq.s32.totalorder %v2168_v45, %v730_v0 }
 0x124   : > { %vm1559_vm10 = vmpackc.low %vm791_vm7, %vm790_vm9  ;;  %v381_v61 = vpop.permute.xlu1 %380  ;;  %v377_v62 = vpop.permute.xlu0 %376  ;;  %vm765_vm9 = vcmp.eq.s32.totalorder %v2168_v45, %v733_v4 }
 0x125   : > { %vm521_vm12 = vcmp.eq.s32.totalorder %v2168_v45, %v381_v61  ;;  %1703 = vmatprep.mubr.msk.bf16.mxu1 %vm1559_vm10, %v1968_v56  ;;  %1751 = vmatprep.mubr.msk.bf16.mxu0 %vm1559_vm10, %v1968_v56  ;;  %vm520_vm13 = vcmp.eq.s32.totalorder %v2168_v45, %v377_v62 }
 0x126   : > { %vm793_vm14 = vmor %vm521_vm12, %vm761_vm11 }
 0x127   : > { %vm792_vm0 = vmor %vm520_vm13, %vm760_vm15  ;;  %vm764_vm13 = vcmp.eq.s32.totalorder %v2168_v45, %v732_v5 }
 0x128   : > { %vm1561_vm1 = vmpackc.low %vm793_vm14, %vm792_vm0  ;;  %v392_v1 = vpop.permute.xlu1 %391  ;;  %v388_v2 = vpop.permute.xlu0 %387  ;;  %vm767_vm0 = vcmp.eq.s32.totalorder %v2168_v45, %v735_v10 }
 0x129   : > { %vm523_vm3 = vcmp.eq.s32.totalorder %v2168_v45, %v392_v1  ;;  %1704 = vmatmul.mubr.msk.bf16.gmra.mrb[4].mxu1 %vm1561_vm1, %v1968_v56  ;;  %1752 = vmatmul.mubr.msk.bf16.gmra.mrb[4].mxu0 %vm1561_vm1, %v1968_v56  ;;  %vm522_vm4 = vcmp.eq.s32.totalorder %v2168_v45, %v388_v2 }
 0x12a   : > { %vm795_vm5 = vmor %vm523_vm3, %vm763_vm2 }
 0x12b   : > { %vm794_vm7 = vmor %vm522_vm4, %vm762_vm6  ;;  %vm766_vm4 = vcmp.eq.s32.totalorder %v2168_v45, %v734_v11 }
 0x12c   : > { %vm1563_vm8 = vmpackc.low %vm795_vm5, %vm794_vm7  ;;  %v403_v6 = vpop.permute.xlu1 %402  ;;  %v399_v7 = vpop.permute.xlu0 %398  ;;  %vm769_vm7 = vcmp.eq.s32.totalorder %v2168_v45, %v737_v17 }
 0x12d   : > { %vm525_vm10 = vcmp.eq.s32.totalorder %v2168_v45, %v403_v6  ;;  %1707 = vmatprep.mubr.msk.bf16.mxu1 %vm1563_vm8, %v1968_v56  ;;  %1755 = vmatprep.mubr.msk.bf16.mxu0 %vm1563_vm8, %v1968_v56  ;;  %vm524_vm11 = vcmp.eq.s32.totalorder %v2168_v45, %v399_v7 }
 0x12e   : > { %vm797_vm12 = vmor %vm525_vm10, %vm765_vm9 }
 0x12f   : > { %vm796_vm14 = vmor %vm524_vm11, %vm764_vm13  ;;  %vm768_vm11 = vcmp.eq.s32.totalorder %v2168_v45, %v736_v19 }
 0x130   : > { %vm1565_vm15 = vmpackc.low %vm797_vm12, %vm796_vm14  ;;  %v414_v13 = vpop.permute.xlu1 %413  ;;  %v410_v15 = vpop.permute.xlu0 %409  ;;  %vm771_vm14 = vcmp.eq.s32.totalorder %v2168_v45, %v739_v23 }
 0x131   : > { %vm527_vm1 = vcmp.eq.s32.totalorder %v2168_v45, %v414_v13  ;;  %1708 = vmatmul.mubr.msk.bf16.gmra.mrb[8].mxu1 %vm1565_vm15, %v1968_v56  ;;  %1756 = vmatmul.mubr.msk.bf16.gmra.mrb[8].mxu0 %vm1565_vm15, %v1968_v56  ;;  %vm526_vm2 = vcmp.eq.s32.totalorder %v2168_v45, %v410_v15 }
 0x132   : > { %vm799_vm3 = vmor %vm527_vm1, %vm767_vm0 }
 0x133   : > { %vm798_vm5 = vmor %vm526_vm2, %vm766_vm4  ;;  %vm770_vm2 = vcmp.eq.s32.totalorder %v2168_v45, %v738_v24 }
 0x134   : > { %vm1567_vm6 = vmpackc.low %vm799_vm3, %vm798_vm5  ;;  %v425_v21 = vpop.permute.xlu1 %424  ;;  %v421_v22 = vpop.permute.xlu0 %420  ;;  %vm773_vm5 = vcmp.eq.s32.totalorder %v2168_v45, %v741_v26 }
 0x135   : > { %vm529_vm8 = vcmp.eq.s32.totalorder %v2168_v45, %v425_v21  ;;  %1711 = vmatprep.mubr.msk.bf16.mxu1 %vm1567_vm6, %v1968_v56  ;;  %1759 = vmatprep.mubr.msk.bf16.mxu0 %vm1567_vm6, %v1968_v56  ;;  %vm528_vm9 = vcmp.eq.s32.totalorder %v2168_v45, %v421_v22 }
 0x136   : > { %vm801_vm10 = vmor %vm529_vm8, %vm769_vm7 }
 0x137   : > { %vm800_vm12 = vmor %vm528_vm9, %vm768_vm11  ;;  %vm772_vm9 = vcmp.eq.s32.totalorder %v2168_v45, %v740_v8 }
 0x138   : > { %vm1569_vm13 = vmpackc.low %vm801_vm10, %vm800_vm12  ;;  %v436_v3 = vpop.permute.xlu1 %435  ;;  %v432_v25 = vpop.permute.xlu0 %431  ;;  %vm775_vm12 = vcmp.eq.s32.totalorder %v2168_v45, %v743_v9 }
 0x139   : > { %vm531_vm15 = vcmp.eq.s32.totalorder %v2168_v45, %v436_v3  ;;  %1712 = vmatmul.mubr.msk.bf16.gmra.mrb[12].mxu1 %vm1569_vm13, %v1968_v56  ;;  %1760 = vmatmul.mubr.msk.bf16.gmra.mrb[12].mxu0 %vm1569_vm13, %v1968_v56  ;;  %vm530_vm0 = vcmp.eq.s32.totalorder %v2168_v45, %v432_v25 }
 0x13a   : > { %vm803_vm1 = vmor %vm531_vm15, %vm771_vm14 }
 0x13b   : > { %vm802_vm3 = vmor %vm530_vm0, %vm770_vm2  ;;  %vm774_vm0 = vcmp.eq.s32.totalorder %v2168_v45, %v742_v12 }
 0x13c   : > { %vm1571_vm4 = vmpackc.low %vm803_vm1, %vm802_vm3  ;;  %v447_v27 = vpop.permute.xlu1 %446  ;;  %v443_v28 = vpop.permute.xlu0 %442  ;;  %vm777_vm3 = vcmp.eq.s32.totalorder %v2168_v45, %v745_v14 }
 0x13d   : > { %vm533_vm6 = vcmp.eq.s32.totalorder %v2168_v45, %v447_v27  ;;  %1715 = vmatprep.mubr.msk.bf16.mxu1 %vm1571_vm4, %v1968_v56  ;;  %1763 = vmatprep.mubr.msk.bf16.mxu0 %vm1571_vm4, %v1968_v56  ;;  %vm532_vm7 = vcmp.eq.s32.totalorder %v2168_v45, %v443_v28 }
 0x13e   : > { %vm805_vm8 = vmor %vm533_vm6, %vm773_vm5 }
 0x13f   : > { %vm804_vm10 = vmor %vm532_vm7, %vm772_vm9  ;;  %vm776_vm7 = vcmp.eq.s32.totalorder %v2168_v45, %v744_v31 }
 0x140   : > { %vm1573_vm11 = vmpackc.low %vm805_vm8, %vm804_vm10  ;;  %v458_v29 = vpop.permute.xlu1 %457  ;;  %v454_v30 = vpop.permute.xlu0 %453  ;;  %vm779_vm10 = vcmp.eq.s32.totalorder %v2168_v45, %v747_v16 }
 0x141   : > { %vm535_vm13 = vcmp.eq.s32.totalorder %v2168_v45, %v458_v29  ;;  %1716 = vmatmul.mubr.msk.bf16.gmra.mrb[16].mxu1 %vm1573_vm11, %v1968_v56  ;;  %1764 = vmatmul.mubr.msk.bf16.gmra.mrb[16].mxu0 %vm1573_vm11, %v1968_v56  ;;  %vm534_vm14 = vcmp.eq.s32.totalorder %v2168_v45, %v454_v30 }
 0x142   : > { %vm807_vm15 = vmor %vm535_vm13, %vm775_vm12 }
 0x143   : > { %vm806_vm1 = vmor %vm534_vm14, %vm774_vm0  ;;  %vm778_vm14 = vcmp.eq.s32.totalorder %v2168_v45, %v746_v34 }
 0x144   : > { %vm1575_vm2 = vmpackc.low %vm807_vm15, %vm806_vm1  ;;  %v469_v32 = vpop.permute.xlu1 %468  ;;  %v465_v33 = vpop.permute.xlu0 %464  ;;  %vm781_vm1 = vcmp.eq.s32.totalorder %v2168_v45, %v749_v36 }
 0x145   : > { %vm537_vm4 = vcmp.eq.s32.totalorder %v2168_v45, %v469_v32  ;;  %1719 = vmatprep.mubr.msk.bf16.mxu1 %vm1575_vm2, %v1968_v56  ;;  %1767 = vmatprep.mubr.msk.bf16.mxu0 %vm1575_vm2, %v1968_v56  ;;  %vm536_vm5 = vcmp.eq.s32.totalorder %v2168_v45, %v465_v33 }
 0x146   : > { %vm809_vm6 = vmor %vm537_vm4, %vm777_vm3 }
 0x147   : > { %vm808_vm8 = vmor %vm536_vm5, %vm776_vm7  ;;  %vm780_vm5 = vcmp.eq.s32.totalorder %v2168_v45, %v748_v37 }
 0x148   : > { %vm1577_vm9 = vmpackc.low %vm809_vm6, %vm808_vm8  ;;  %v480_v18 = vpop.permute.xlu1 %479  ;;  %v476_v35 = vpop.permute.xlu0 %475  ;;  %vm783_vm8 = vcmp.eq.s32.totalorder %v2168_v45, %v751_v39 }
 0x149   : > { %vm539_vm11 = vcmp.eq.s32.totalorder %v2168_v45, %v480_v18  ;;  %1720 = vmatmul.mubr.msk.bf16.gmra.mrb[20].mxu1 %vm1577_vm9, %v1968_v56  ;;  %1768 = vmatmul.mubr.msk.bf16.gmra.mrb[20].mxu0 %vm1577_vm9, %v1968_v56  ;;  %vm538_vm12 = vcmp.eq.s32.totalorder %v2168_v45, %v476_v35 }
 0x14a   : > { %vm811_vm13 = vmor %vm539_vm11, %vm779_vm10 }
 0x14b   : > { %vm810_vm15 = vmor %vm538_vm12, %vm778_vm14  ;;  %vm782_vm12 = vcmp.eq.s32.totalorder %v2168_v45, %v750_v40 }
 0x14c   : > { %vm1579_vm0 = vmpackc.low %vm811_vm13, %vm810_vm15  ;;  %v491_v20 = vpop.permute.xlu1 %490  ;;  %v487_v38 = vpop.permute.xlu0 %486  ;;  %vm785_vm15 = vcmp.eq.s32.totalorder %v2168_v45, %v753_v42 }
 0x14d   : > { %vm541_vm2 = vcmp.eq.s32.totalorder %v2168_v45, %v491_v20  ;;  %1723 = vmatprep.mubr.msk.bf16.mxu1 %vm1579_vm0, %v1968_v56  ;;  %1771 = vmatprep.mubr.msk.bf16.mxu0 %vm1579_vm0, %v1968_v56  ;;  %vm540_vm3 = vcmp.eq.s32.totalorder %v2168_v45, %v487_v38 }
 0x14e   : > { %vm813_vm4 = vmor %vm541_vm2, %vm781_vm1 }
 0x14f   : > { %vm812_vm6 = vmor %vm540_vm3, %vm780_vm5  ;;  %vm784_vm3 = vcmp.eq.s32.totalorder %v2168_v45, %v752_v43 }
 0x150   : > { %vm1581_vm7 = vmpackc.low %vm813_vm4, %vm812_vm6  ;;  %v502_v41 = vpop.permute.xlu1 %501  ;;  %v498_v48 = vpop.permute.xlu0 %497  ;;  %vm1348_vm6 = vcmask 261120  }
 0x151   : > { %vm543_vm9 = vcmp.eq.s32.totalorder %v2168_v45, %v502_v41  ;;  %1724 = vmatmul.mubr.msk.bf16.gmra.mrb[24].mxu1 %vm1581_vm7, %v1968_v56  ;;  %1772 = vmatmul.mubr.msk.bf16.gmra.mrb[24].mxu0 %vm1581_vm7, %v1968_v56  ;;  %vm542_vm10 = vcmp.eq.s32.totalorder %v2168_v45, %v498_v48 }
 0x152   : > { %vm815_vm11 = vmor %vm543_vm9, %vm783_vm8 }
 0x153   : > { %vm814_vm13 = vmor %vm542_vm10, %vm782_vm12 }
 0x154   : > { %vm1583_vm14 = vmpackc.low %vm815_vm11, %vm814_vm13  ;;  %v513_v44 = vpop.permute.xlu1 %512  ;;  %v509_v49 = vpop.permute.xlu0 %508 }
 0x155   : > { %vm545_vm0 = vcmp.eq.s32.totalorder %v2168_v45, %v513_v44  ;;  %1727 = vmatprep.mubr.msk.bf16.mxu1 %vm1583_vm14, %v1968_v56  ;;  %1775 = vmatprep.mubr.msk.bf16.mxu0 %vm1583_vm14, %v1968_v56  ;;  %vm544_vm1 = vcmp.eq.s32.totalorder %v2168_v45, %v509_v49 }
 0x156   : > { %vm817_vm2 = vmor %vm545_vm0, %vm785_vm15 }
 0x157   : > { %vm816_vm4 = vmor %vm544_vm1, %vm784_vm3 }
 0x158   : > { %vm1585_vm5 = vmpackc.low %vm817_vm2, %vm816_vm4 }
 0x159   : > { %1728 = vmatmul.mubr.msk.bf16.gmra.mrb[28].mxu1 %vm1585_vm5, %v1968_v56  ;;  %1776 = vmatmul.mubr.msk.bf16.gmra.mrb[28].mxu0 %vm1585_vm5, %v1968_v56 }
 0x1f4   : > { %v1701_v46 = vpop.f32.mrb[0].mxu1  ;;  %v1749_v50 = vpop.f32.mrb[0].mxu0 }
 0x1f5   : > { %v1230_v51 = vadd.f32 %v1749_v50, %v1701_v46  ;;  %v1012_v52 = vpop.f32.mrb[1].mxu1  ;;  %v1221_v53 = vpop.f32.mrb[1].mxu0 }
 0x1f6   : > { %v1222_v54 = vadd.f32 %v1221_v53, %v1012_v52  ;;  %v1702_v55 = vpop.f32.mrb[2].mxu1  ;;  %v1750_v47 = vpop.f32.mrb[2].mxu0 }
 0x1f7   : > { %1351 = vst.msk [vmem:[%s2387_s9 + $0x10] sm:$0xff] %vm1348_vm6, %v1230_v51  ;;  %v1233_v45 = vadd.f32 %v1750_v47, %v1702_v55  ;;  %v1015_v56 = vpop.f32.mrb[3].mxu1  ;;  %v1224_v57 = vpop.f32.mrb[3].mxu0 }
 0x1f8   : > { %1349 = vst.msk [vmem:[%s2387_s9] sm:$0xff] %vm1348_vm6, %v1222_v54  ;;  %v1225_v58 = vadd.f32 %v1224_v57, %v1015_v56 }
 0x1f9   : > { %1352 = vst.msk [vmem:[%s2387_s9 + $0x18] sm:$0xff] %vm1348_vm6, %v1233_v45 }
 0x1fa   : > { %1350 = vst.msk [vmem:[%s2387_s9 + $0x8] sm:$0xff] %vm1348_vm6, %v1225_v58 }
 0x1fc   : > { %v1705_v59 = vpop.f32.mrb[4].mxu1  ;;  %v1753_v60 = vpop.f32.mrb[4].mxu0 }
 0x1fd   : > { %v1246_v61 = vadd.f32 %v1753_v60, %v1705_v59  ;;  %v1028_v62 = vpop.f32.mrb[5].mxu1  ;;  %v1237_v63 = vpop.f32.mrb[5].mxu0 }
 0x1fe   : > { %v1238_v0 = vadd.f32 %v1237_v63, %v1028_v62  ;;  %v1706_v1 = vpop.f32.mrb[6].mxu1  ;;  %v1754_v2 = vpop.f32.mrb[6].mxu0 }
 0x1ff   : > { %1355 = vst.msk [vmem:[%s2387_s9 + $0x30] sm:$0xff] %vm1348_vm6, %v1246_v61  ;;  %v1249_v4 = vadd.f32 %v1754_v2, %v1706_v1  ;;  %v1031_v5 = vpop.f32.mrb[7].mxu1  ;;  %v1240_v6 = vpop.f32.mrb[7].mxu0 }
 0x200   : > { %1353 = vst.msk [vmem:[%s2387_s9 + $0x20] sm:$0xff] %vm1348_vm6, %v1238_v0  ;;  %v1241_v7 = vadd.f32 %v1240_v6, %v1031_v5 }
 0x201   : > { %1356 = vst.msk [vmem:[%s2387_s9 + $0x38] sm:$0xff] %vm1348_vm6, %v1249_v4 }
 0x202   : > { %1354 = vst.msk [vmem:[%s2387_s9 + $0x28] sm:$0xff] %vm1348_vm6, %v1241_v7 }
 0x204   : > { %v1709_v10 = vpop.f32.mrb[8].mxu1  ;;  %v1757_v11 = vpop.f32.mrb[8].mxu0 }
 0x205   : > { %v1262_v13 = vadd.f32 %v1757_v11, %v1709_v10  ;;  %v1044_v15 = vpop.f32.mrb[9].mxu1  ;;  %v1253_v17 = vpop.f32.mrb[9].mxu0 }
 0x206   : > { %v1254_v19 = vadd.f32 %v1253_v17, %v1044_v15  ;;  %v1710_v21 = vpop.f32.mrb[10].mxu1  ;;  %v1758_v22 = vpop.f32.mrb[10].mxu0 }
 0x207   : > { %1359 = vst.msk [vmem:[%s2387_s9 + $0x50] sm:$0xff] %vm1348_vm6, %v1262_v13  ;;  %v1265_v23 = vadd.f32 %v1758_v22, %v1710_v21  ;;  %v1047_v24 = vpop.f32.mrb[11].mxu1  ;;  %v1256_v3 = vpop.f32.mrb[11].mxu0 }
 0x208   : > { %1357 = vst.msk [vmem:[%s2387_s9 + $0x40] sm:$0xff] %vm1348_vm6, %v1254_v19  ;;  %v1257_v25 = vadd.f32 %v1256_v3, %v1047_v24 }
 0x209   : > { %1360 = vst.msk [vmem:[%s2387_s9 + $0x58] sm:$0xff] %vm1348_vm6, %v1265_v23 }
 0x20a   : > { %1358 = vst.msk [vmem:[%s2387_s9 + $0x48] sm:$0xff] %vm1348_vm6, %v1257_v25 }
 0x20c   : > { %v1713_v26 = vpop.f32.mrb[12].mxu1  ;;  %v1761_v8 = vpop.f32.mrb[12].mxu0 }
 0x20d   : > { %v1278_v27 = vadd.f32 %v1761_v8, %v1713_v26  ;;  %v1060_v28 = vpop.f32.mrb[13].mxu1  ;;  %v1269_v9 = vpop.f32.mrb[13].mxu0 }
 0x20e   : > { %v1270_v12 = vadd.f32 %v1269_v9, %v1060_v28  ;;  %v1714_v29 = vpop.f32.mrb[14].mxu1  ;;  %v1762_v30 = vpop.f32.mrb[14].mxu0 }
 0x20f   : > { %1363 = vst.msk [vmem:[%s2387_s9 + $0x70] sm:$0xff] %vm1348_vm6, %v1278_v27  ;;  %v1281_v14 = vadd.f32 %v1762_v30, %v1714_v29  ;;  %v1063_v31 = vpop.f32.mrb[15].mxu1  ;;  %v1272_v32 = vpop.f32.mrb[15].mxu0 }
 0x210   : > { %1361 = vst.msk [vmem:[%s2387_s9 + $0x60] sm:$0xff] %vm1348_vm6, %v1270_v12  ;;  %v1273_v33 = vadd.f32 %v1272_v32, %v1063_v31 }
 0x211   : > { %1364 = vst.msk [vmem:[%s2387_s9 + $0x78] sm:$0xff] %vm1348_vm6, %v1281_v14 }
 0x212   : > { %1362 = vst.msk [vmem:[%s2387_s9 + $0x68] sm:$0xff] %vm1348_vm6, %v1273_v33 }
 0x214   : > { %v1717_v16 = vpop.f32.mrb[16].mxu1  ;;  %v1765_v34 = vpop.f32.mrb[16].mxu0 }
 0x215   : > { %v1294_v18 = vadd.f32 %v1765_v34, %v1717_v16  ;;  %v1076_v35 = vpop.f32.mrb[17].mxu1  ;;  %v1285_v36 = vpop.f32.mrb[17].mxu0 }
 0x216   : > { %v1286_v37 = vadd.f32 %v1285_v36, %v1076_v35  ;;  %v1718_v20 = vpop.f32.mrb[18].mxu1  ;;  %v1766_v38 = vpop.f32.mrb[18].mxu0 }
 0x217   : > { %1367 = vst.msk [vmem:[%s2387_s9 + $0x90] sm:$0xff] %vm1348_vm6, %v1294_v18  ;;  %v1297_v39 = vadd.f32 %v1766_v38, %v1718_v20  ;;  %v1079_v40 = vpop.f32.mrb[19].mxu1  ;;  %v1288_v41 = vpop.f32.mrb[19].mxu0 }
 0x218   : > { %1365 = vst.msk [vmem:[%s2387_s9 + $0x80] sm:$0xff] %vm1348_vm6, %v1286_v37  ;;  %v1289_v48 = vadd.f32 %v1288_v41, %v1079_v40 }
 0x219   : > { %1368 = vst.msk [vmem:[%s2387_s9 + $0x98] sm:$0xff] %vm1348_vm6, %v1297_v39 }
 0x21a   : > { %1366 = vst.msk [vmem:[%s2387_s9 + $0x88] sm:$0xff] %vm1348_vm6, %v1289_v48 }
 0x21c   : > { %v1721_v42 = vpop.f32.mrb[20].mxu1  ;;  %v1769_v43 = vpop.f32.mrb[20].mxu0 }
 0x21d   : > { %v1310_v44 = vadd.f32 %v1769_v43, %v1721_v42  ;;  %v1092_v49 = vpop.f32.mrb[21].mxu1  ;;  %v1301_v46 = vpop.f32.mrb[21].mxu0 }
 0x21e   : > { %v1302_v50 = vadd.f32 %v1301_v46, %v1092_v49  ;;  %v1722_v51 = vpop.f32.mrb[22].mxu1  ;;  %v1770_v52 = vpop.f32.mrb[22].mxu0 }
 0x21f   : > { %1371 = vst.msk [vmem:[%s2387_s9 + $0xb0] sm:$0xff] %vm1348_vm6, %v1310_v44  ;;  %v1313_v53 = vadd.f32 %v1770_v52, %v1722_v51  ;;  %v1095_v54 = vpop.f32.mrb[23].mxu1  ;;  %v1304_v55 = vpop.f32.mrb[23].mxu0 }
 0x220   : > { %1369 = vst.msk [vmem:[%s2387_s9 + $0xa0] sm:$0xff] %vm1348_vm6, %v1302_v50  ;;  %v1305_v47 = vadd.f32 %v1304_v55, %v1095_v54 }
 0x221   : > { %1372 = vst.msk [vmem:[%s2387_s9 + $0xb8] sm:$0xff] %vm1348_vm6, %v1313_v53 }
 0x222   : > { %1370 = vst.msk [vmem:[%s2387_s9 + $0xa8] sm:$0xff] %vm1348_vm6, %v1305_v47 }
 0x224   : > { %v1725_v45 = vpop.f32.mrb[24].mxu1  ;;  %v1773_v56 = vpop.f32.mrb[24].mxu0 }
 0x225   : > { %v1326_v57 = vadd.f32 %v1773_v56, %v1725_v45  ;;  %v1108_v58 = vpop.f32.mrb[25].mxu1  ;;  %v1317_v59 = vpop.f32.mrb[25].mxu0 }
 0x226   : > { %v1318_v60 = vadd.f32 %v1317_v59, %v1108_v58  ;;  %v1726_v61 = vpop.f32.mrb[26].mxu1  ;;  %v1774_v62 = vpop.f32.mrb[26].mxu0 }
 0x227   : > { %1375 = vst.msk [vmem:[%s2387_s9 + $0xd0] sm:$0xff] %vm1348_vm6, %v1326_v57  ;;  %v1329_v63 = vadd.f32 %v1774_v62, %v1726_v61  ;;  %v1111_v0 = vpop.f32.mrb[27].mxu1  ;;  %v1320_v1 = vpop.f32.mrb[27].mxu0 }
 0x228   : > { %1373 = vst.msk [vmem:[%s2387_s9 + $0xc0] sm:$0xff] %vm1348_vm6, %v1318_v60  ;;  %v1321_v2 = vadd.f32 %v1320_v1, %v1111_v0 }
 0x229   : > { %1376 = vst.msk [vmem:[%s2387_s9 + $0xd8] sm:$0xff] %vm1348_vm6, %v1329_v63 }
 0x22a   : > { %1374 = vst.msk [vmem:[%s2387_s9 + $0xc8] sm:$0xff] %vm1348_vm6, %v1321_v2 }
 0x22c   : > { %v1729_v4 = vpop.f32.mrb[28].mxu1  ;;  %v1777_v5 = vpop.f32.mrb[28].mxu0 }
 0x22d   : > { %v1342_v6 = vadd.f32 %v1777_v5, %v1729_v4  ;;  %v1124_v7 = vpop.f32.mrb[29].mxu1  ;;  %v1333_v10 = vpop.f32.mrb[29].mxu0 }
 0x22e   : > { %v1334_v11 = vadd.f32 %v1333_v10, %v1124_v7  ;;  %v1730_v13 = vpop.f32.mrb[30].mxu1  ;;  %v1778_v15 = vpop.f32.mrb[30].mxu0 }
 0x22f   : > { %1379 = vst.msk [vmem:[%s2387_s9 + $0xf0] sm:$0xff] %vm1348_vm6, %v1342_v6  ;;  %v1345_v17 = vadd.f32 %v1778_v15, %v1730_v13  ;;  %v1127_v19 = vpop.f32.mrb[31].mxu1  ;;  %v1336_v21 = vpop.f32.mrb[31].mxu0 }
 0x230   : > { %1377 = vst.msk [vmem:[%s2387_s9 + $0xe0] sm:$0xff] %vm1348_vm6, %v1334_v11  ;;  %v1337_v22 = vadd.f32 %v1336_v21, %v1127_v19 }
 0x231   : > { %1380 = vst.msk [vmem:[%s2387_s9 + $0xf8] sm:$0xff] %vm1348_vm6, %v1345_v17 }
 0x232   : > { %1378 = vst.msk [vmem:[%s2387_s9 + $0xe8] sm:$0xff] %vm1348_vm6, %v1337_v22 }
 0x233   : > { %1900 = shalt.err (!%p1897_p5)
}
 0x234   : > { %s1901_s25 = scalar_lea.hbm %s2452_s21, 4096  ;;  %s1905_s7 = scalar_lea.hbm %s2515_s5, 8192 }
 0x235   : > { %p1902_p6 = scmp.ne.s32.totalorder %s2452_s21, %s1901_s25  ;;  %p1906_p10 = scmp.lt.u32.totalorder %s2452_s21, %s2515_s5 }
 0x236   : > { %p1907_p11 = scmp.lt.u32.totalorder %s1905_s7, %s1901_s25  ;;  %p1909_p13 = scmp.lt.u32.totalorder %s1901_s25, %s2452_s21 }
 0x237   : > { %p1903_p7 = pnand %p1902_p6, %p2042_p4 }
 0x238   : > { %p1908_p12 = por %p1907_p11, %p1906_p10 }
 0x239   : > { %p1904_p9 = pneg %p1903_p7 }
 0x23a   : > { %p1910_p0 = por %p1909_p13, %p1908_p12 }
 0x23c   : > { %p1911_p1 = pnand %p1910_p0, %p1904_p9 }
 0x23e   : > { %1914 = shalt.err (!%p1911_p1)
}
 0x23f   : > { %s1970_s10 = smov 128   ;;  %s1971_s12 = smov 8  }
 0x240   : > { %1811 = dma.vmem_to_hbm [thread:$0]  (%p2042_p4), %s2454_s11, 4096, %s2452_s21, %s2464_s14, %s1970_s10, %s1970_s10, %s1971_s12  }
 0x241 PF: > { %p1817_p2 = scmp.ge.s32.totalorder %s1965_s23, 2  ;;  %s1413_s13 = sand.u32 1, %s1945_s18  }
 0x242   : > { %s1414_s15 = scalar_lea.sflag [#allocation3], %s1413_s13 }
 0x243   : > { %p1814_p3 = pnand %p1817_p2, %p2049_p8 }
 0x245   : > { %1940 = dma.done.wait (!%p1814_p3), %s1414_s15, 4096  }
 0x246   : > { %1942 = vsyncadd (!%p1814_p3), %s1414_s15, 4294963200  ;;  %s18_s23 = sadd.s32 1, %s1965_s23   ;;  %s2518_s18 = smov %s1949_s19 }
 0x247   : > { %p15_p5 = scmp.ge.s32.totalorder %s18_s23, 4   ;;  %s2519_s19 = smov %s1953_s20 }
 0x248   : > { %s2520_s20 = smov %s2055_s6  ;;  %s2521_s21 = smov %s1961_s22 }
 0x249   : > { %s2522_s22 = smov %s2524_s26  ;;  %17 = sbr.rel (!%p15_p5) target bundleno = 4 (0x4), region = 81 }
 0x250   :  { %1419 = vsyncpa [#allocation3], 1 }
 0x251   :  { %1421 = vsyncpa [#allocation3 + $0x1], 1 }

</bundles_post_ra>
